<compile_context>
chip_gen: v5e
topology: v5e:2x2
jax: 0.10.0
libtpu: 0.0.40
codegen_flags: <defaults>
</compile_context>

<pallas_src>
import functools

import jax
import jax.numpy as jnp
from jax.experimental import pallas as pl
from jax.experimental.pallas import tpu as pltpu


def _ffn_ln_kernel(x_ref, w1_ref, w2_ref, o_ref, acc_ref, *, eps):
    # x_ref : (tm, D)   flattened (batch*seq) rows, d_model on the lane axis
    # w1_ref: (D, tf)   fc1 weight tile (pre-transposed, bf16)
    # w2_ref: (tf, D)   fc2 weight tile (pre-transposed, bf16)
    # o_ref : (tm, D)
    # acc_ref: (tm, D)  f32 accumulator, persists across the d_ff grid axis
    f = pl.program_id(1)

    @pl.when(f == 0)
    def _():
        acc_ref[...] = jnp.zeros_like(acc_ref)

    # MXU in bf16, f32 accumulation. ReLU is elementwise over d_ff, so applying
    # it per d_ff tile before the second matmul is exact.
    xb = x_ref[...].astype(jnp.bfloat16)
    h = jnp.dot(xb, w1_ref[...], preferred_element_type=jnp.float32)
    h = jnp.maximum(h, 0.0).astype(jnp.bfloat16)
    acc_ref[...] += jnp.dot(h, w2_ref[...], preferred_element_type=jnp.float32)

    @pl.when(f == pl.num_programs(1) - 1)
    def _():
        # residual + LayerNorm(d_model) in f32; fresh nn.LayerNorm => gamma=1, beta=0.
        y = acc_ref[...] + x_ref[...].astype(jnp.float32)
        mean = jnp.mean(y, axis=-1, keepdims=True)          # XLU cross-lane reduce
        c = y - mean
        var = jnp.mean(c * c, axis=-1, keepdims=True)
        o_ref[...] = (c * jax.lax.rsqrt(var + eps)).astype(o_ref.dtype)  # EUP rsqrt


def prepare_ffn_weights(w1, w2):
    """One-time weight preprocessing (hoisted out of the per-call path).

    w1: (d_ff, d_model) = nn.Linear(d_model, d_ff, bias=False).weight (PyTorch layout)
    w2: (d_model, d_ff) = nn.Linear(d_ff, d_model, bias=False).weight
    Returns (w1_t, w2_t) in matmul layout, cast to bf16 for the MXU.
    """
    w1_t = jnp.asarray(w1).T.astype(jnp.bfloat16)   # (D, F)
    w2_t = jnp.asarray(w2).T.astype(jnp.bfloat16)   # (F, D)
    return w1_t, w2_t


def _vmem_budget_bytes():
    # Generation-aware: ~3/4 of physical VMEM, capped at 100 MiB.
    # v7x (64 MiB) -> 48 MiB; v5e/v6e (128 MiB) -> 96 MiB. Conservative fallback.
    try:
        cap = pltpu.get_tpu_info().vmem_capacity_bytes
        return min(int(cap) * 3 // 4, 100 * 1024 * 1024)
    except Exception:
        return 48 * 1024 * 1024


def poswise_ffn(x, w1_t, w2_t, *, eps=1e-5, block_m=512, block_f=512):
    """PoswiseFeedForwardNet.forward.

    x    : (B, S, D) inputs
    w1_t : (D, F)    pre-transposed bf16 fc1 weight (from prepare_ffn_weights)
    w2_t : (F, D)    pre-transposed bf16 fc2 weight
    """
    B, S, D = x.shape
    Dw, F_ = w1_t.shape
    assert Dw == D and w2_t.shape == (F_, D)

    M = B * S
    x2 = x.reshape(M, D)                  # metadata-only reshape, no HBM copy
    x_bytes = x2.dtype.itemsize
    vmem_budget = _vmem_budget_bytes()

    # d_ff tile: a multiple of 128 that divides F (a ragged d_ff block would
    # leak garbage partial products into the accumulator); fall back to full F.
    tf = min(block_f, F_)
    if F_ % tf != 0 or (tf % 128 != 0 and tf != F_):
        tf = F_
        start = (min(block_f, F_) // 128) * 128
        for cand in range(start, 127, -128):
            if F_ % cand == 0:
                tf = cand
                break

    # Row-block: multiple of 8 (sublane), shrunk until the double-buffered
    # working set fits the per-generation VMEM budget.
    tm = max(8, (min(block_m, M) // 8) * 8)

    def _vmem_need(tm_):
        return (2 * tm_ * D * x_bytes      # x block (double-buffered)
                + 2 * tm_ * D * x_bytes    # out block (double-buffered)
                + tm_ * D * 4              # f32 accumulator scratch
                + 2 * D * tf * 2           # w1 tile, bf16, double-buffered
                + 2 * tf * D * 2)          # w2 tile, bf16, double-buffered

    while tm > 8 and _vmem_need(tm) > vmem_budget:
        tm = max(8, (tm // 2 // 8) * 8)

    grid = (pl.cdiv(M, tm), pl.cdiv(F_, tf))   # d_ff (reduction) axis last

    cost = pl.CostEstimate(
        flops=4 * M * D * F_,                  # two matmuls: 2*M*D*F each
        transcendentals=0,
        bytes_accessed=(x2.size * x_bytes
                        + w1_t.size * w1_t.dtype.itemsize
                        + w2_t.size * w2_t.dtype.itemsize
                        + M * D * x_bytes),
    )

    out2 = pl.pallas_call(
        functools.partial(_ffn_ln_kernel, eps=eps),
        out_shape=jax.ShapeDtypeStruct((M, D), x.dtype),
        grid=grid,
        in_specs=[
            pl.BlockSpec((tm, D), lambda i, f: (i, 0)),    # x rows (const along f)
            pl.BlockSpec((D, tf), lambda i, f: (0, f)),    # w1 tile, streamed over d_ff
            pl.BlockSpec((tf, D), lambda i, f: (f, 0)),    # w2 tile, streamed over d_ff
        ],
        out_specs=pl.BlockSpec((tm, D), lambda i, f: (i, 0)),
        scratch_shapes=[pltpu.VMEM((tm, D), jnp.float32)],
        compiler_params=pltpu.CompilerParams(
            dimension_semantics=("parallel", "arbitrary"),
            vmem_limit_bytes=vmem_budget,
        ),
        cost_estimate=cost,
    )(x2, w1_t, w2_t)

    return out2.reshape(B, S, D)


def _reference(x, w1, w2, eps=1e-5):
    # Pure-JAX f32 mirror of the PyTorch module (fresh LayerNorm: gamma=1, beta=0).
    h = jnp.maximum(x @ w1.T, 0.0)
    y = h @ w2.T + x
    mean = jnp.mean(y, axis=-1, keepdims=True)
    var = jnp.mean((y - mean) ** 2, axis=-1, keepdims=True)
    return (y - mean) / jnp.sqrt(var + eps)


if __name__ == "__main__":
    # batch=2, seq_len=8, d_model=128 (lane-dense), d_ff=256
    B, S, D, F_ = 2, 8, 128, 256

    key = jax.random.PRNGKey(0)
    kx, k1, k2 = jax.random.split(key, 3)
    x = jax.random.normal(kx, (B, S, D), jnp.float32)
    w1 = 0.1 * jax.random.normal(k1, (F_, D), jnp.float32)   # nn.Linear(d_model, d_ff).weight
    w2 = 0.1 * jax.random.normal(k2, (D, F_), jnp.float32)   # nn.Linear(d_ff, d_model).weight

    # One-time weight prep (transpose + bf16), outside the per-call path.
    w1_t, w2_t = prepare_ffn_weights(w1, w2)

    out = jax.block_until_ready(poswise_ffn(x, w1_t, w2_t))
    ref = jax.block_until_ready(_reference(x, w1, w2))

    assert out.shape == (B, S, D)
    # bf16 MXU inputs with f32 accumulation: allow bf16-level tolerance vs f32 ref.
    assert jnp.allclose(out, ref, atol=2.5e-2, rtol=2.5e-2), "mismatch vs reference"
    print("KERNEL_OK")
</pallas_src>

<mosaic_0001>
module attributes {stable_mosaic.version = 11 : i64} {
  func.func @_ffn_ln_kernel(%arg0: i32, %arg1: i32, %arg2: memref<16x128xf32, #tpu.memory_space<vmem>>, %arg3: memref<128x256xbf16, #tpu.memory_space<vmem>>, %arg4: memref<256x128xbf16, #tpu.memory_space<vmem>>, %arg5: memref<16x128xf32, #tpu.memory_space<vmem>>, %arg6: memref<16x128xf32, #tpu.memory_space<vmem>>) attributes {dimension_semantics = [#tpu.dimension_semantics<parallel>, #tpu.dimension_semantics<arbitrary>], iteration_bounds = array<i64: 1, 1>, scalar_prefetch = 0 : i64, scratch_operands = 1 : i64, tpu.core_type = #tpu.core_type<tc>, window_params = [{transform_indices = @transform_0, window_bounds = array<i64: 16, 128>}, {transform_indices = @transform_1, window_bounds = array<i64: 128, 256>}, {transform_indices = @transform_2, window_bounds = array<i64: 256, 128>}, {transform_indices = @transform_3, window_bounds = array<i64: 16, 128>}]} {
    %c0_i32 = arith.constant 0 : i32
    %0 = arith.cmpi eq, %arg1, %c0_i32 : i32
    %1 = arith.extui %0 : i1 to i32
    %c0_i32_0 = arith.constant 0 : i32
    %2 = arith.cmpi ne, %1, %c0_i32_0 : i32
    scf.if %2 {
      %cst_14 = arith.constant 0.000000e+00 : f32
      %18 = vector.broadcast %cst_14 : f32 to vector<16x128xf32>
      %c0_15 = arith.constant 0 : index
      %c0_16 = arith.constant 0 : index
      %19 = vector.load %arg6[%c0_15, %c0_16] : memref<16x128xf32, #tpu.memory_space<vmem>>, vector<16x128xf32>
      tpu.vector_store %arg6[%c0_15, %c0_16], %18 {strides = array<i32>} : memref<16x128xf32, #tpu.memory_space<vmem>>, vector<16x128xf32>,
    } else {
    }
    %c0 = arith.constant 0 : index
    %c0_1 = arith.constant 0 : index
    %3 = vector.load %arg2[%c0, %c0_1] : memref<16x128xf32, #tpu.memory_space<vmem>>, vector<16x128xf32>
    %4 = arith.truncf %3 : vector<16x128xf32> to vector<16x128xbf16>
    %c0_2 = arith.constant 0 : index
    %c0_3 = arith.constant 0 : index
    %5 = vector.load %arg3[%c0_2, %c0_3] : memref<128x256xbf16, #tpu.memory_space<vmem>>, vector<128x256xbf16>
    %cst = arith.constant dense<0.000000e+00> : vector<16x256xf32>
    %6 = tpu.matmul %4, %5, %cst {dimension_numbers = #tpu.dot_dimension_numbers<[1], [0], [0], [1], [0, 0, 1, 1], [], []>} : vector<16x128xbf16>, vector<128x256xbf16>, vector<16x256xf32> -> vector<16x256xf32>
    %cst_4 = arith.constant 0.000000e+00 : f32
    %7 = vector.broadcast %cst_4 : f32 to vector<16x256xf32>
    %8 = arith.maximumf %6, %7 : vector<16x256xf32>
    %9 = arith.truncf %8 : vector<16x256xf32> to vector<16x256xbf16>
    %c0_5 = arith.constant 0 : index
    %c0_6 = arith.constant 0 : index
    %10 = vector.load %arg6[%c0_5, %c0_6] : memref<16x128xf32, #tpu.memory_space<vmem>>, vector<16x128xf32>
    %c0_7 = arith.constant 0 : index
    %c0_8 = arith.constant 0 : index
    %11 = vector.load %arg4[%c0_7, %c0_8] : memref<256x128xbf16, #tpu.memory_space<vmem>>, vector<256x128xbf16>
    %cst_9 = arith.constant dense<0.000000e+00> : vector<16x128xf32>
    %12 = tpu.matmul %9, %11, %cst_9 {dimension_numbers = #tpu.dot_dimension_numbers<[1], [0], [0], [1], [0, 0, 1, 1], [], []>} : vector<16x256xbf16>, vector<256x128xbf16>, vector<16x128xf32> -> vector<16x128xf32>
    %13 = arith.addf %10, %12 : vector<16x128xf32>
    %c0_10 = arith.constant 0 : index
    %c0_11 = arith.constant 0 : index
    %14 = vector.load %arg6[%c0_10, %c0_11] : memref<16x128xf32, #tpu.memory_space<vmem>>, vector<16x128xf32>
    tpu.vector_store %arg6[%c0_10, %c0_11], %13 {strides = array<i32>} : memref<16x128xf32, #tpu.memory_space<vmem>>, vector<16x128xf32>,
    %c0_i32_12 = arith.constant 0 : i32
    %15 = arith.cmpi eq, %arg1, %c0_i32_12 : i32
    %16 = arith.extui %15 : i1 to i32
    %c0_i32_13 = arith.constant 0 : i32
    %17 = arith.cmpi ne, %16, %c0_i32_13 : i32
    scf.if %17 {
      %c0_14 = arith.constant 0 : index
      %c0_15 = arith.constant 0 : index
      %18 = vector.load %arg6[%c0_14, %c0_15] : memref<16x128xf32, #tpu.memory_space<vmem>>, vector<16x128xf32>
      %c0_16 = arith.constant 0 : index
      %c0_17 = arith.constant 0 : index
      %19 = vector.load %arg2[%c0_16, %c0_17] : memref<16x128xf32, #tpu.memory_space<vmem>>, vector<16x128xf32>
      %20 = arith.addf %18, %19 : vector<16x128xf32>
      %cst_18 = arith.constant dense<0.000000e+00> : vector<16xf32>
      %21 = vector.multi_reduction <add>, %20, %cst_18 [1] : vector<16x128xf32> to vector<16xf32>
      %22 = vector.shape_cast %21 : vector<16xf32> to vector<16x1xf32>
      %cst_19 = arith.constant 1.280000e+02 : f32
      %23 = vector.broadcast %cst_19 : f32 to vector<16x1xf32>
      %24 = arith.divf %22, %23 : vector<16x1xf32>
      %25 = vector.broadcast %24 : vector<16x1xf32> to vector<16x128xf32>
      %26 = arith.subf %20, %25 : vector<16x128xf32>
      %27 = arith.mulf %26, %26 : vector<16x128xf32>
      %cst_20 = arith.constant dense<0.000000e+00> : vector<16xf32>
      %28 = vector.multi_reduction <add>, %27, %cst_20 [1] : vector<16x128xf32> to vector<16xf32>
      %29 = vector.shape_cast %28 : vector<16xf32> to vector<16x1xf32>
      %cst_21 = arith.constant 1.280000e+02 : f32
      %30 = vector.broadcast %cst_21 : f32 to vector<16x1xf32>
      %31 = arith.divf %29, %30 : vector<16x1xf32>
      %cst_22 = arith.constant 9.99999974E-6 : f32
      %32 = vector.broadcast %cst_22 : f32 to vector<16x1xf32>
      %33 = arith.addf %31, %32 : vector<16x1xf32>
      %34 = math.rsqrt %33 : vector<16x1xf32>
      %35 = vector.broadcast %34 : vector<16x1xf32> to vector<16x128xf32>
      %36 = arith.mulf %26, %35 : vector<16x128xf32>
      %c0_23 = arith.constant 0 : index
      %c0_24 = arith.constant 0 : index
      %37 = vector.load %arg5[%c0_23, %c0_24] : memref<16x128xf32, #tpu.memory_space<vmem>>, vector<16x128xf32>
      tpu.vector_store %arg5[%c0_23, %c0_24], %36 {strides = array<i32>} : memref<16x128xf32, #tpu.memory_space<vmem>>, vector<16x128xf32>,
    } else {
    }
    return
  }
  func.func @transform_0(%arg0: i32, %arg1: i32) -> (i32, i32) {
    %c0_i32 = arith.constant 0 : i32
    %c0_i32_0 = arith.constant 0 : i32
    return %arg0, %c0_i32 : i32, i32
  }
  func.func @transform_1(%arg0: i32, %arg1: i32) -> (i32, i32) {
    %c0_i32 = arith.constant 0 : i32
    %c0_i32_0 = arith.constant 0 : i32
    return %c0_i32, %arg1 : i32, i32
  }
  func.func @transform_2(%arg0: i32, %arg1: i32) -> (i32, i32) {
    %c0_i32 = arith.constant 0 : i32
    %c0_i32_0 = arith.constant 0 : i32
    return %arg1, %c0_i32 : i32, i32
  }
  func.func @transform_3(%arg0: i32, %arg1: i32) -> (i32, i32) {
    %c0_i32 = arith.constant 0 : i32
    %c0_i32_0 = arith.constant 0 : i32
    return %arg0, %c0_i32 : i32, i32
  }
}

</mosaic_0001>

<bundles_post_ra>
// kernel: tpu_custom_call.1
= control target key start
LH: loop header
LB: loop body
LE: loop exit
PB: predicated region body
PF: predicated region fallthrough
CT: control target
= control target key end

     0   :  { %8 = vsyncpa [#allocation4], 0  ;;  %s768_s0 = inlined_call_operand.hbm [shape: f32[16,128], index: 0, kind: input, shape index: {}]   ;;  %s769_s1 = inlined_call_operand.hbm [shape: bf16[128,256], index: 1, kind: input, shape index: {}]   ;;  %s770_s2 = inlined_call_operand.hbm [shape: bf16[256,128], index: 2, kind: input, shape index: {}]   ;;  %s771_s3 = inlined_call_operand.hbm [shape: f32[16,128], index: 3, kind: output, shape index: {}]  }
   0x1   :  { %9 = vsyncpa [#allocation7], 0 }
   0x2   :  { %10 = vsyncpa [#allocation5], 0  ;;  %s28_s14 = sshll.u32 %s769_s1, 4  ;;  %s718_s15 = smov [#allocation6]   ;;  %s29_s14 = int_to_ptr.hbm [resolvable:$true] %s28_s14 }
   0x3   :  { %s30_s16 = sshll.u32 %s718_s15, 4  ;;  %s15_s19 = sshll.u32 %s768_s0, 4  ;;  %s31_s16 = int_to_ptr.vmem [resolvable:$true] %s30_s16  ;;  %s16_s19 = int_to_ptr.hbm [resolvable:$true] %s15_s19 }
   0x4   :  { %s719_s20 = smov 128   ;;  %s720_s21 = smov 8  }
   0x5   :  { %36 = dma.hbm_to_vmem [thread:$0]  %s29_s14, 2048, %s31_s16, [#allocation7], %s719_s20, %s719_s20, %s720_s21  }
   0x6   :  { %s721_s22 = smov [#allocation3]   ;;  %s41_s1 = sshll.u32 %s770_s2, 4  ;;  %s42_s1 = int_to_ptr.hbm [resolvable:$true] %s41_s1 }
   0x7   :  { %s17_s23 = sshll.u32 %s721_s22, 4  ;;  %s722_s0 = smov [#allocation8]   ;;  %s18_s23 = int_to_ptr.vmem [resolvable:$true] %s17_s23 }
   0x8   :  { %23 = dma.hbm_to_vmem [thread:$0]  %s16_s19, 256, %s18_s23, [#allocation4], %s719_s20, %s719_s20, %s720_s21  }
   0x9   :  { %s43_s26 = sshll.u32 %s722_s0, 4  ;;  %s723_s27 = smov 64   ;;  %s44_s26 = int_to_ptr.vmem [resolvable:$true] %s43_s26 }
   0xa   :  { %s724_s28 = smov 4  }
   0xb   :  { %49 = dma.hbm_to_vmem [thread:$0]  %s42_s1, 2048, %s44_s26, [#allocation7], %s723_s27, %s723_s27, %s724_s28  }
   0xc   :  { %712 = dma.done.wait [#allocation4], 256  }
   0xd   :  { %713 = vsyncadd [#allocation4], 4294967040 }
   0xe   :  { %714 = dma.done.wait [#allocation7], 4096  }
   0xf   :  { %715 = vsyncadd [#allocation7], 4294963200  ;;  %v499_v0 = vld [vmem:[#allocation6 + $0x70] sm:$0xf]  ;;  %v584_v1 = vld [vmem:[#allocation6 + $0x74] sm:$0xf0] }
  0x10   :  { %v583_v2 = vld [vmem:[#allocation6 + $0x74] sm:$0xf]  ;;  %v500_v3 = vor.u32 %v584_v1, %v499_v0  ;;  %v501_v4 = vld [vmem:[#allocation6 + $0x78] sm:$0xf0]  ;;  %v491_v5 = vld [vmem:[#allocation6 + $0x60] sm:$0xf] }
  0x11   :  { %v582_v6 = vld [vmem:[#allocation6 + $0x64] sm:$0xf0]  ;;  %v504_v7 = vor.u32 %v583_v2, %v501_v4  ;;  %v581_v8 = vld [vmem:[#allocation6 + $0x64] sm:$0xf]  ;;  %v493_v9 = vld [vmem:[#allocation6 + $0x68] sm:$0xf0] }
  0x12   :  { %167 = vmatpush.bf16.msra.mxu0 %v500_v3  ;;  %v492_v10 = vor.u32 %v582_v6, %v491_v5  ;;  %v496_v11 = vor.u32 %v581_v8, %v493_v9  ;;  %v483_v12 = vld [vmem:[#allocation6 + $0x50] sm:$0xf]  ;;  %v580_v13 = vld [vmem:[#allocation6 + $0x54] sm:$0xf0]  ;;  %v579_v14 = vld [vmem:[#allocation6 + $0x54] sm:$0xf] }
  0x13   :  { %181 = vmatpush.bf16.msra.mxu1 %v504_v7  ;;  %v485_v15 = vld [vmem:[#allocation6 + $0x58] sm:$0xf0]  ;;  %v484_v16 = vor.u32 %v580_v13, %v483_v12  ;;  %v475_v18 = vld [vmem:[#allocation6 + $0x40] sm:$0xf]  ;;  %v578_v19 = vld [vmem:[#allocation6 + $0x44] sm:$0xf0] }
  0x14   :  { %v488_v17 = vor.u32 %v579_v14, %v485_v15  ;;  %v577_v20 = vld [vmem:[#allocation6 + $0x44] sm:$0xf]  ;;  %v477_v21 = vld [vmem:[#allocation6 + $0x48] sm:$0xf0]  ;;  %v476_v22 = vor.u32 %v578_v19, %v475_v18  ;;  %v592_v23 = vld [vmem:[#allocation8 + $0x38] sm:$0xff]  ;;  %s726_s2 = smov [#allocation9]  }
  0x15   :  { %v600_v24 = vld [vmem:[#allocation8 + $0x78] sm:$0xff]  ;;  %v480_v25 = vor.u32 %v577_v20, %v477_v21  ;;  %v467_v26 = vld [vmem:[#allocation6 + $0x30] sm:$0xf]  ;;  %v575_v28 = vld [vmem:[#allocation6 + $0x34] sm:$0xf]  ;;  %331 = vmatpush.bf16.msra.mxu2 %v592_v23  ;;  %v725_v21 = vmov 128.0  }
  0x16   :  { %168 = vmatpush.bf16.msra.mxu0 %v492_v10  ;;  %v576_v27 = vld [vmem:[#allocation6 + $0x34] sm:$0xf0]  ;;  %v469_v29 = vld [vmem:[#allocation6 + $0x38] sm:$0xf0]  ;;  %345 = vmatpush.bf16.msra.mxu3 %v600_v24  ;;  %v591_v30 = vld [vmem:[#allocation8 + $0x30] sm:$0xff]  ;;  %610 = vrcp.f32 %v725_v21  ;;  %s425_s29 = sshll.u32 %s726_s2, 4  ;;  %s426_s29 = int_to_ptr.vmem [resolvable:$true] %s425_s29 }
  0x17   :  { %182 = vmatpush.bf16.msra.mxu1 %v496_v11  ;;  %v599_v31 = vld [vmem:[#allocation8 + $0x70] sm:$0xff]  ;;  %v468_v32 = vor.u32 %v576_v27, %v467_v26  ;;  %v472_v33 = vor.u32 %v575_v28, %v469_v29  ;;  %v459_v34 = vld [vmem:[#allocation6 + $0x20] sm:$0xf]  ;;  %v574_v35 = vld [vmem:[#allocation6 + $0x24] sm:$0xf0]  ;;  %s427_s5 = sshll.u32 %s771_s3, 4  ;;  %s428_s5 = int_to_ptr.hbm [resolvable:$true] %s427_s5 }
  0x18   :  { %v573_v36 = vld [vmem:[#allocation6 + $0x24] sm:$0xf]  ;;  %v461_v37 = vld [vmem:[#allocation6 + $0x28] sm:$0xf0]  ;;  %v460_v40 = vor.u32 %v574_v35, %v459_v34  ;;  %v451_v42 = vld [vmem:[#allocation6 + $0x10] sm:$0xf] }
  0x19   :  { %332 = vmatpush.bf16.msra.mxu2 %v591_v30  ;;  %v590_v38 = vld [vmem:[#allocation8 + $0x28] sm:$0xff]  ;;  %v464_v41 = vor.u32 %v573_v36, %v461_v37  ;;  %v572_v43 = vld [vmem:[#allocation6 + $0x14] sm:$0xf0]  ;;  %v571_v44 = vld [vmem:[#allocation6 + $0x14] sm:$0xf] }
  0x1a   :  { %169 = vmatpush.bf16.msra.mxu0 %v484_v16  ;;  %346 = vmatpush.bf16.msra.mxu3 %v599_v31  ;;  %v598_v39 = vld [vmem:[#allocation8 + $0x68] sm:$0xff]  ;;  %v453_v45 = vld [vmem:[#allocation6 + $0x18] sm:$0xf0]  ;;  %v589_v46 = vld [vmem:[#allocation8 + $0x20] sm:$0xff]  ;;  %v452_v48 = vor.u32 %v572_v43, %v451_v42 }
  0x1b   :  { %183 = vmatpush.bf16.msra.mxu1 %v488_v17  ;;  %v597_v47 = vld [vmem:[#allocation8 + $0x60] sm:$0xff]  ;;  %v456_v49 = vor.u32 %v571_v44, %v453_v45  ;;  %v570_v51 = vld [vmem:[#allocation6 + $0x4] sm:$0xf0]  ;;  %v445_v53 = vld [vmem:[#allocation6 + $0x8] sm:$0xf0] }
  0x1c   :  { %v443_v50 = vld [vmem:[#allocation6] sm:$0xf]  ;;  %v569_v52 = vld [vmem:[#allocation6 + $0x4] sm:$0xf]  ;;  %v588_v54 = vld [vmem:[#allocation8 + $0x18] sm:$0xff] }
  0x1d   :  { %333 = vmatpush.bf16.msra.mxu2 %v590_v38  ;;  %v596_v55 = vld [vmem:[#allocation8 + $0x58] sm:$0xff]  ;;  %v444_v56 = vor.u32 %v570_v51, %v443_v50  ;;  %v68_v57 = vld [vmem:[#allocation3] sm:$0xff]  ;;  %v448_v59 = vor.u32 %v569_v52, %v445_v53  ;;  %v586_v63 = vld [vmem:[#allocation8 + $0x8] sm:$0xff] }
  0x1e   :  { %170 = vmatpush.bf16.msra.mxu0 %v476_v22  ;;  %347 = vmatpush.bf16.msra.mxu3 %v598_v39  ;;  %v69_v58 = vld [vmem:[#allocation3 + $0x8] sm:$0xff]  ;;  %v587_v61 = vld [vmem:[#allocation8 + $0x10] sm:$0xff]  ;;  %v594_v0 = vld [vmem:[#allocation8 + $0x48] sm:$0xff]  ;;  %v611_v22 = vpop.eup %610 }
  0x1f   :  { %184 = vmatpush.bf16.msra.mxu1 %v480_v25  ;;  %v70_v60 = vpack.c.bf16 %v69_v58, %v68_v57  ;;  %v595_v62 = vld [vmem:[#allocation8 + $0x50] sm:$0xff]  ;;  %v585_v1 = vld [vmem:[#allocation8] sm:$0xff]  ;;  %v377_v23 = vmul.f32 128.0, %v611_v22  ;;  %vm381_vm0 = vweird.f32 %v611_v22 }
  0x20   :  { %v593_v2 = vld [vmem:[#allocation8 + $0x40] sm:$0xff] }
  0x21   :  { %334 = vmatpush.bf16.msra.mxu2 %v589_v46  ;;  %v378_v24 = vsub.f32 1.0, %v377_v23 }
  0x22   :  { %171 = vmatpush.bf16.msra.mxu0 %v468_v32  ;;  %348 = vmatpush.bf16.msra.mxu3 %v597_v47 }
  0x23   :  { %185 = vmatpush.bf16.msra.mxu1 %v472_v33  ;;  %v379_v25 = vmul.f32 %v611_v22, %v378_v24 }
  0x25   :  { %335 = vmatpush.bf16.msra.mxu2 %v588_v54  ;;  %v380_v26 = vadd.f32 %v611_v22, %v379_v25 }
  0x26   :  { %172 = vmatpush.bf16.msra.mxu0 %v460_v40  ;;  %349 = vmatpush.bf16.msra.mxu3 %v596_v55 }
  0x27   :  { %186 = vmatpush.bf16.msra.mxu1 %v464_v41  ;;  %v382_v27 = vsel %vm381_vm0, %v611_v22, %v380_v26 }
  0x29   :  { %336 = vmatpush.bf16.msra.mxu2 %v587_v61 }
  0x2a   :  { %173 = vmatpush.bf16.msra.mxu0 %v452_v48  ;;  %350 = vmatpush.bf16.msra.mxu3 %v595_v62 }
  0x2b   :  { %187 = vmatpush.bf16.msra.mxu1 %v456_v49 }
  0x2d   :  { %337 = vmatpush.bf16.msra.mxu2 %v586_v63 }
  0x2e   :  { %174 = vmatpush.bf16.msra.mxu0 %v444_v56  ;;  %351 = vmatpush.bf16.msra.mxu3 %v594_v0 }
  0x2f   :  { %188 = vmatpush.bf16.msra.mxu1 %v448_v59 }
  0x31   :  { %175 = vmatmul.bf16.vlgmr.msra.gmra.mxu0 %v70_v60  ;;  %338 = vmatpush.bf16.msra.mxu2 %v585_v1 }
  0x32   :  { %189 = vmatmul.bf16.vlgmr.msra.gmra.mxu1 %v70_v60  ;;  %352 = vmatpush.bf16.msra.mxu3 %v593_v2 }
  0xae   :  { %v176_v3 = vpop.f32.mrf.mxu0 }
  0xaf   :  { %v190_v4 = vpop.f32.mrf.mxu1  ;;  %v195_v6 = vmax.f32 %v176_v3, 0.0 }
  0xb0   :  { %v196_v9 = vmax.f32 %v190_v4, 0.0 }
  0xb6   :  { %v178_v5 = vpop.f32.mrf.mxu0 }
  0xb7   :  { %v197_v7 = vmax.f32 %v178_v5, 0.0  ;;  %v192_v8 = vpop.f32.mrf.mxu1 }
  0xb8   :  { %v198_v10 = vmax.f32 %v192_v8, 0.0 }
  0xb9   :  { %v199_v11 = vpack.c.bf16 %v197_v7, %v195_v6 }
  0xba   :  { %v200_v12 = vpack.c.bf16 %v198_v10, %v196_v9 }
  0xbb   :  { %339 = vmatmul.bf16.vlgmr.msra.gmra.mxu2 %v199_v11 }
  0xbc   :  { %353 = vmatmul.bf16.vlgmr.msra.gmra.mxu3 %v200_v12 }
 0x13e   :  { %v340_v13 = vpop.f32.mrf.mxu2 }
 0x13f   :  { %v354_v14 = vpop.f32.mrf.mxu3 }
 0x140   :  { %v355_v15 = vadd.f32 %v354_v14, %v340_v13 }
 0x142   :  { %v370_v16 = vadd.f32 %v355_v15, %v68_v57 }
 0x144   :  { %372 = vadd.xlane.f32.xlu0 %v370_v16 }
 0x146   :  { %v342_v17 = vpop.f32.mrf.mxu2 }
 0x147   :  { %v356_v18 = vpop.f32.mrf.mxu3 }
 0x148   :  { %v357_v19 = vadd.f32 %v356_v18, %v342_v17 }
 0x14a   :  { %v371_v20 = vadd.f32 %v357_v19, %v69_v58 }
 0x14c   :  { %374 = vadd.xlane.f32.xlu0 %v371_v20 }
 0x1b7   :  { %v373_v28 = vpop.xlane.xlu0 %372 }
 0x1b8   :  { %v383_v29 = vmul.f32 %v382_v27, %v373_v28 }
 0x1ba   :  { %v385_v30 = vsub.f32 %v370_v16, %v383_v29 }
 0x1bc   :  { %v387_v31 = vmul.f32 %v385_v30, %v385_v30 }
 0x1be   :  { %389 = vadd.xlane.f32.xlu1 %v387_v31 }
 0x1bf   :  { %v375_v32 = vpop.xlane.xlu0 %374 }
 0x1c0   :  { %v384_v33 = vmul.f32 %v382_v27, %v375_v32 }
 0x1c2   :  { %v386_v34 = vsub.f32 %v371_v20, %v384_v33 }
 0x1c4   :  { %v388_v35 = vmul.f32 %v386_v34, %v386_v34 }
 0x1c6   :  { %391 = vadd.xlane.f32.xlu1 %v388_v35 }
 0x231   :  { %v390_v36 = vpop.xlane.xlu1 %389 }
 0x232   :  { %v393_v37 = vmul.f32 %v390_v36, %v382_v27 }
 0x234   :  { %v395_v38 = vadd.f32 1e-05, %v393_v37 }
 0x236   :  { %612 = vrsqrt.f32 %v395_v38  ;;  %vm403_vm2 = vweird.f32 %v395_v38 }
 0x239   :  { %v392_v39 = vpop.xlane.xlu1 %391 }
 0x23a   :  { %v394_v40 = vmul.f32 %v392_v39, %v382_v27 }
 0x23c   :  { %v613_v41 = vpop.eup %612  ;;  %v396_v42 = vadd.f32 1e-05, %v394_v40 }
 0x23d   :  { %v398_v43 = vmul.f32 %v613_v41, %v395_v38  ;;  %vm404_vm1 = vweird.f32 %v613_v41 }
 0x23e   :  { %614 = vrsqrt.f32 %v396_v42  ;;  %vm405_vm3 = vmor %vm403_vm2, %vm404_vm1  ;;  %vm413_vm5 = vweird.f32 %v396_v42 }
 0x23f   :  { %v399_v44 = vmul.f32 %v613_v41, %v398_v43 }
 0x241   :  { %v400_v45 = vmul.f32 0.5, %v399_v44 }
 0x243   :  { %v401_v46 = vsub.f32 1.5, %v400_v45 }
 0x244   :  { %v615_v47 = vpop.eup %614 }
 0x245   :  { %v402_v48 = vmul.f32 %v613_v41, %v401_v46  ;;  %v408_v49 = vmul.f32 %v615_v47, %v396_v42  ;;  %vm414_vm4 = vweird.f32 %v615_v47 }
 0x246   :  { %vm415_vm6 = vmor %vm413_vm5, %vm414_vm4 }
 0x247   :  { %v409_v50 = vmul.f32 %v615_v47, %v408_v49  ;;  %v406_v51 = vsel %vm405_vm3, %v613_v41, %v402_v48 }
 0x248   :  { %v417_v52 = vmul.f32 %v406_v51, %v385_v30 }
 0x249   :  { %v410_v53 = vmul.f32 0.5, %v409_v50 }
 0x24a   :  { %419 = vst [vmem:[#allocation9] sm:$0xff] %v417_v52 }
 0x24b   :  { %v411_v54 = vsub.f32 1.5, %v410_v53 }
 0x24d   :  { %v412_v55 = vmul.f32 %v615_v47, %v411_v54 }
 0x24f   :  { %v416_v56 = vsel %vm415_vm6, %v615_v47, %v412_v55 }
 0x250   :  { %v418_v57 = vmul.f32 %v416_v56, %v386_v34 }
 0x252   :  { %420 = vst [vmem:[#allocation9 + $0x8] sm:$0xff] %v418_v57 }
 0x253   :  { %433 = dma.vmem_to_hbm [thread:$0]  %s426_s29, 256, %s428_s5, [#allocation5], %s719_s20, %s719_s20, %s720_s21  }
 0x254   :  { %716 = dma.done.wait [#allocation5], 256  }
 0x255   :  { %717 = vsyncadd [#allocation5], 4294967040 }
 0x256   :  { %438 = vsyncpa [#allocation4], 1 }
 0x257   :  { %439 = vsyncpa [#allocation7], 1 }
 0x258   :  { %440 = vsyncpa [#allocation5], 1 }

</bundles_post_ra>
